<compile_context>
chip_gen: v7x
topology: tpu7x:2x2x1
jax: 0.10.0
libtpu: 0.0.40
codegen_flags: <defaults>
</compile_context>

<pallas_src>
import math

import jax
import jax.numpy as jnp
from jax.experimental import pallas as pl
from jax.experimental.pallas import tpu as pltpu


def _round_up(x, m):
    return (x + m - 1) // m * m


def _nbytes(shape, dtype):
    return math.prod(shape) * jnp.dtype(dtype).itemsize


# ----------------------------------------------------------------------------
# Pass 1: S = X @ W   (tiled matmul, bf16 in, f32 accumulate, bf16 out)
# ----------------------------------------------------------------------------
def matmul_kernel(x_ref, w_ref, out_ref, acc_ref):
    k = pl.program_id(1)

    @pl.when(k == 0)
    def _():
        acc_ref[...] = jnp.zeros_like(acc_ref)

    acc_ref[...] += jnp.dot(x_ref[...], w_ref[...],
                            preferred_element_type=jnp.float32)

    @pl.when(k == pl.num_programs(1) - 1)
    def _():
        out_ref[...] = acc_ref[...].astype(out_ref.dtype)


def _matmul(x, w, *, tile_m, tile_k, out_dtype):
    m, kdim = x.shape
    n_out = w.shape[1]
    grid = (m // tile_m, kdim // tile_k)

    flops = 2 * m * kdim * n_out
    bytes_accessed = (_nbytes(x.shape, x.dtype) + _nbytes(w.shape, w.dtype)
                      + _nbytes((m, n_out), out_dtype))

    return pl.pallas_call(
        matmul_kernel,
        out_shape=jax.ShapeDtypeStruct((m, n_out), out_dtype),
        grid_spec=pltpu.PrefetchScalarGridSpec(
            num_scalar_prefetch=0,
            grid=grid,
            in_specs=[
                pl.BlockSpec((tile_m, tile_k), lambda i, k: (i, k)),   # x tile
                pl.BlockSpec((tile_k, n_out), lambda i, k: (k, 0)),    # W k-slab
            ],
            out_specs=pl.BlockSpec((tile_m, n_out), lambda i, k: (i, 0)),
            scratch_shapes=[pltpu.VMEM((tile_m, n_out), jnp.float32)],
        ),
        compiler_params=pltpu.CompilerParams(
            dimension_semantics=("parallel", "arbitrary")),
        cost_estimate=pl.CostEstimate(flops=flops, transcendentals=0,
                                      bytes_accessed=bytes_accessed),
    )(x, w)


# ----------------------------------------------------------------------------
# Pass 2: Z = relu(adj @ S + b) @ W2   (aggregation + fused next-layer transform)
# ----------------------------------------------------------------------------
def aggregate_fused_kernel(adj_ref, s_ref, b_ref, w2_ref, out_ref, acc_ref):
    k = pl.program_id(1)

    @pl.when(k == 0)
    def _():
        acc_ref[...] = jnp.zeros_like(acc_ref)

    acc_ref[...] += jnp.dot(adj_ref[...], s_ref[...],
                            preferred_element_type=jnp.float32)

    @pl.when(k == pl.num_programs(1) - 1)
    def _():
        y = jnp.maximum(acc_ref[...] + b_ref[...], 0.0)        # bias + ReLU in f32
        out_ref[...] = jnp.dot(y.astype(w2_ref.dtype), w2_ref[...],
                               preferred_element_type=jnp.float32
                               ).astype(out_ref.dtype)


def _aggregate_fused(adj, s, b, w2, *, tile_m, tile_k, out_dtype):
    n_p = adj.shape[0]
    f_mid = s.shape[1]
    f_out = w2.shape[1]
    grid = (n_p // tile_m, n_p // tile_k)

    flops = 2 * n_p * n_p * f_mid + 2 * n_p * f_mid * f_out
    bytes_accessed = (_nbytes(adj.shape, adj.dtype) + _nbytes(s.shape, s.dtype)
                      + _nbytes(b.shape, b.dtype) + _nbytes(w2.shape, w2.dtype)
                      + _nbytes((n_p, f_out), out_dtype))

    return pl.pallas_call(
        aggregate_fused_kernel,
        out_shape=jax.ShapeDtypeStruct((n_p, f_out), out_dtype),
        grid_spec=pltpu.PrefetchScalarGridSpec(
            num_scalar_prefetch=0,
            grid=grid,
            in_specs=[
                pl.BlockSpec((tile_m, tile_k), lambda i, k: (i, k)),   # adj tile
                pl.BlockSpec((tile_k, f_mid), lambda i, k: (k, 0)),    # S1 k-rows
                pl.BlockSpec((1, f_mid), lambda i, k: (0, 0)),         # b1 (resident)
                pl.BlockSpec((f_mid, f_out), lambda i, k: (0, 0)),     # W2 (resident)
            ],
            out_specs=pl.BlockSpec((tile_m, f_out), lambda i, k: (i, 0)),
            scratch_shapes=[pltpu.VMEM((tile_m, f_mid), jnp.float32)],
        ),
        compiler_params=pltpu.CompilerParams(
            dimension_semantics=("parallel", "arbitrary")),
        cost_estimate=pl.CostEstimate(flops=flops, transcendentals=0,
                                      bytes_accessed=bytes_accessed),
    )(adj, s, b, w2)


# ----------------------------------------------------------------------------
# Pass 3: out = adj @ Z + b   (plain aggregation, accumulate directly in out)
# ----------------------------------------------------------------------------
def aggregate_kernel(adj_ref, s_ref, b_ref, out_ref):
    k = pl.program_id(1)

    @pl.when(k == 0)
    def _():
        out_ref[...] = jnp.zeros_like(out_ref)

    out_ref[...] += jnp.dot(adj_ref[...], s_ref[...],
                            preferred_element_type=jnp.float32)

    @pl.when(k == pl.num_programs(1) - 1)
    def _():
        out_ref[...] += b_ref[...]


def _aggregate(adj, s, b, *, tile_m, tile_k):
    n_p = adj.shape[0]
    f_out = s.shape[1]
    grid = (n_p // tile_m, n_p // tile_k)

    flops = 2 * n_p * n_p * f_out
    bytes_accessed = (_nbytes(adj.shape, adj.dtype) + _nbytes(s.shape, s.dtype)
                      + _nbytes(b.shape, b.dtype)
                      + _nbytes((n_p, f_out), jnp.float32))

    return pl.pallas_call(
        aggregate_kernel,
        out_shape=jax.ShapeDtypeStruct((n_p, f_out), jnp.float32),
        grid_spec=pltpu.PrefetchScalarGridSpec(
            num_scalar_prefetch=0,
            grid=grid,
            in_specs=[
                pl.BlockSpec((tile_m, tile_k), lambda i, k: (i, k)),   # adj tile
                pl.BlockSpec((tile_k, f_out), lambda i, k: (k, 0)),    # Z k-rows
                pl.BlockSpec((1, f_out), lambda i, k: (0, 0)),         # b (resident)
            ],
            out_specs=pl.BlockSpec((tile_m, f_out), lambda i, k: (i, 0)),
        ),
        compiler_params=pltpu.CompilerParams(
            dimension_semantics=("parallel", "arbitrary")),
        cost_estimate=pl.CostEstimate(flops=flops, transcendentals=0,
                                      bytes_accessed=bytes_accessed),
    )(adj, s, b)


# ----------------------------------------------------------------------------
# Full forward
# ----------------------------------------------------------------------------
def gcn_forward(x, adj, w1, b1, w2, b2, *,
                tile_n=256, tile_fin=512, compute_dtype=jnp.bfloat16):
    """out = gc2(relu(gc1(x, adj)), adj), eval mode (dropouts identity)."""
    n, f_in = x.shape
    nhid = w1.shape[1]
    nclass = w2.shape[1]

    # Tile sizes: shrink for small problems; single tile for both adj axes so
    # n_p always divides the grid evenly.
    tile_n = min(tile_n, _round_up(n, 128))
    tile_fin = min(tile_fin, _round_up(f_in, 128))

    n_p = _round_up(n, tile_n)
    f_in_p = _round_up(f_in, tile_fin)
    nhid_p = _round_up(nhid, 128)
    nclass_p = _round_up(nclass, 128)

    # Pad + cast ONCE (adj reused by both aggregation passes).  Zero padding is
    # exact: padded nodes/features contribute 0 through zero adj columns / W rows.
    adj_p = jnp.pad(adj, ((0, n_p - n), (0, n_p - n))).astype(compute_dtype)
    x_p = jnp.pad(x, ((0, n_p - n), (0, f_in_p - f_in))).astype(compute_dtype)
    w1_p = jnp.pad(w1, ((0, f_in_p - f_in), (0, nhid_p - nhid))).astype(compute_dtype)
    b1_p = jnp.pad(b1.reshape(1, -1), ((0, 0), (0, nhid_p - nhid))).astype(jnp.float32)
    w2_p = jnp.pad(w2, ((0, nhid_p - nhid), (0, nclass_p - nclass))).astype(compute_dtype)
    b2_p = jnp.pad(b2.reshape(1, -1), ((0, 0), (0, nclass_p - nclass))).astype(jnp.float32)

    # Pass 1: S1 = x @ W1  (computed exactly once).
    s1 = _matmul(x_p, w1_p, tile_m=tile_n, tile_k=tile_fin,
                 out_dtype=compute_dtype)

    # Pass 2: Z2 = relu(adj @ S1 + b1) @ W2   (layer-2 transform fused into the
    # layer-1 epilogue; padded rows of Z2 are non-zero but killed by the zero
    # adj columns in pass 3).
    z2 = _aggregate_fused(adj_p, s1, b1_p, w2_p, tile_m=tile_n, tile_k=tile_n,
                          out_dtype=compute_dtype)

    # Pass 3: out = adj @ Z2 + b2
    out_p = _aggregate(adj_p, z2, b2_p, tile_m=tile_n, tile_k=tile_n)

    return out_p[:n, :nclass]


def init_gc_params(key, in_features, out_features):
    # Kipf GraphConvolution init: weight [in, out], uniform(-k, k), k = 1/sqrt(out)
    kw, kb = jax.random.split(key)
    bound = 1.0 / (out_features ** 0.5)
    w = jax.random.uniform(kw, (in_features, out_features), jnp.float32, -bound, bound)
    b = jax.random.uniform(kb, (out_features,), jnp.float32, -bound, bound)
    return w, b


if __name__ == "__main__":
    key = jax.random.PRNGKey(0)
    k_x, k_adj, k_gc1, k_gc2 = jax.random.split(key, 4)

    # Small graph: N nodes, nfeat -> nhid -> nclass
    N, nfeat, nhid, nclass = 16, 48, 32, 7

    x = jax.random.normal(k_x, (N, nfeat), jnp.float32)

    # Deterministic symmetric normalized adjacency with self-loops (GCN-style).
    a = (jax.random.uniform(k_adj, (N, N)) > 0.5).astype(jnp.float32)
    a = jnp.maximum(a, a.T)
    a = a + jnp.eye(N, dtype=jnp.float32)
    deg_inv_sqrt = 1.0 / jnp.sqrt(a.sum(axis=1))
    adj = a * deg_inv_sqrt[:, None] * deg_inv_sqrt[None, :]

    w1, b1 = init_gc_params(k_gc1, nfeat, nhid)
    w2, b2 = init_gc_params(k_gc2, nhid, nclass)

    out = gcn_forward(x, adj, w1, b1, w2, b2)
    out = jax.block_until_ready(out)

    # Pure-JAX f32 reference (kernel streams bf16 -> loose tolerance).
    h_ref = jnp.maximum(adj @ (x @ w1) + b1, 0.0)
    ref = adj @ (h_ref @ w2) + b2

    assert out.shape == (N, nclass)
    max_err = float(jnp.max(jnp.abs(out - ref)))
    assert max_err < 5e-2, f"max abs err {max_err}"

    print("KERNEL_OK")
</pallas_src>

<mosaic_0001>
module attributes {stable_mosaic.version = 11 : i64} {
  func.func @matmul_kernel(%arg0: i32, %arg1: i32, %arg2: memref<128x128xbf16, #tpu.memory_space<vmem>>, %arg3: memref<128x128xbf16, #tpu.memory_space<vmem>>, %arg4: memref<128x128xbf16, #tpu.memory_space<vmem>>, %arg5: memref<128x128xf32, #tpu.memory_space<vmem>>) attributes {dimension_semantics = [#tpu.dimension_semantics<parallel>, #tpu.dimension_semantics<arbitrary>], iteration_bounds = array<i64: 1, 1>, scalar_prefetch = 0 : i64, scratch_operands = 1 : i64, tpu.core_type = #tpu.core_type<tc>, window_params = [{transform_indices = @transform_0, window_bounds = array<i64: 128, 128>}, {transform_indices = @transform_1, window_bounds = array<i64: 128, 128>}, {transform_indices = @transform_2, window_bounds = array<i64: 128, 128>}]} {
    %c0_i32 = arith.constant 0 : i32
    %0 = arith.cmpi eq, %arg1, %c0_i32 : i32
    %1 = arith.extui %0 : i1 to i32
    %c0_i32_0 = arith.constant 0 : i32
    %2 = arith.cmpi ne, %1, %c0_i32_0 : i32
    scf.if %2 {
      %cst_10 = arith.constant 0.000000e+00 : f32
      %12 = vector.broadcast %cst_10 : f32 to vector<128x128xf32>
      %c0_11 = arith.constant 0 : index
      %c0_12 = arith.constant 0 : index
      %13 = vector.load %arg5[%c0_11, %c0_12] : memref<128x128xf32, #tpu.memory_space<vmem>>, vector<128x128xf32>
      tpu.vector_store %arg5[%c0_11, %c0_12], %12 {strides = array<i32>} : memref<128x128xf32, #tpu.memory_space<vmem>>, vector<128x128xf32>,
    } else {
    }
    %c0 = arith.constant 0 : index
    %c0_1 = arith.constant 0 : index
    %3 = vector.load %arg5[%c0, %c0_1] : memref<128x128xf32, #tpu.memory_space<vmem>>, vector<128x128xf32>
    %c0_2 = arith.constant 0 : index
    %c0_3 = arith.constant 0 : index
    %4 = vector.load %arg2[%c0_2, %c0_3] : memref<128x128xbf16, #tpu.memory_space<vmem>>, vector<128x128xbf16>
    %c0_4 = arith.constant 0 : index
    %c0_5 = arith.constant 0 : index
    %5 = vector.load %arg3[%c0_4, %c0_5] : memref<128x128xbf16, #tpu.memory_space<vmem>>, vector<128x128xbf16>
    %cst = arith.constant dense<0.000000e+00> : vector<128x128xf32>
    %6 = tpu.matmul %4, %5, %cst {dimension_numbers = #tpu.dot_dimension_numbers<[1], [0], [0], [1], [0, 0, 1, 1], [], []>} : vector<128x128xbf16>, vector<128x128xbf16>, vector<128x128xf32> -> vector<128x128xf32>
    %7 = arith.addf %3, %6 : vector<128x128xf32>
    %c0_6 = arith.constant 0 : index
    %c0_7 = arith.constant 0 : index
    %8 = vector.load %arg5[%c0_6, %c0_7] : memref<128x128xf32, #tpu.memory_space<vmem>>, vector<128x128xf32>
    tpu.vector_store %arg5[%c0_6, %c0_7], %7 {strides = array<i32>} : memref<128x128xf32, #tpu.memory_space<vmem>>, vector<128x128xf32>,
    %c0_i32_8 = arith.constant 0 : i32
    %9 = arith.cmpi eq, %arg1, %c0_i32_8 : i32
    %10 = arith.extui %9 : i1 to i32
    %c0_i32_9 = arith.constant 0 : i32
    %11 = arith.cmpi ne, %10, %c0_i32_9 : i32
    scf.if %11 {
      %c0_10 = arith.constant 0 : index
      %c0_11 = arith.constant 0 : index
      %12 = vector.load %arg5[%c0_10, %c0_11] : memref<128x128xf32, #tpu.memory_space<vmem>>, vector<128x128xf32>
      %13 = arith.truncf %12 : vector<128x128xf32> to vector<128x128xbf16>
      %c0_12 = arith.constant 0 : index
      %c0_13 = arith.constant 0 : index
      %14 = vector.load %arg4[%c0_12, %c0_13] : memref<128x128xbf16, #tpu.memory_space<vmem>>, vector<128x128xbf16>
      tpu.vector_store %arg4[%c0_12, %c0_13], %13 {strides = array<i32>} : memref<128x128xbf16, #tpu.memory_space<vmem>>, vector<128x128xbf16>,
    } else {
    }
    return
  }
  func.func @transform_0(%arg0: i32, %arg1: i32) -> (i32, i32) {
    %c0_i32 = arith.constant 0 : i32
    return %arg0, %arg1 : i32, i32
  }
  func.func @transform_1(%arg0: i32, %arg1: i32) -> (i32, i32) {
    %c0_i32 = arith.constant 0 : i32
    %c0_i32_0 = arith.constant 0 : i32
    return %arg1, %c0_i32 : i32, i32
  }
  func.func @transform_2(%arg0: i32, %arg1: i32) -> (i32, i32) {
    %c0_i32 = arith.constant 0 : i32
    %c0_i32_0 = arith.constant 0 : i32
    return %arg0, %c0_i32 : i32, i32
  }
}

</mosaic_0001>

<bundles_post_ra>
// kernel: tpu_custom_call.1
= control target key start
LH: loop header
LB: loop body
LE: loop exit
PB: predicated region body
PF: predicated region fallthrough
CT: control target
= control target key end

     0   :  { %7 = vsyncpa [#allocation4], 0  ;;  %s768_s0 = inlined_call_operand.hbm [shape: bf16[128,128], index: 0, kind: input, shape index: {}]   ;;  %s769_s1 = inlined_call_operand.hbm [shape: bf16[128,128], index: 1, kind: input, shape index: {}]   ;;  %s770_s2 = inlined_call_operand.hbm [shape: bf16[128,128], index: 2, kind: output, shape index: {}]  }
   0x1   :  { %8 = vsyncpa [#allocation7], 0 }
   0x2   :  { %9 = vsyncpa [#allocation5], 0  ;;  %s703_s9 = smov [#allocation3]   ;;  %s631_s13 = scalar_lea.hbm %s768_s0, 1024 }
   0x3   :  { %s15_s10 = sshll.u32 %s703_s9, 4  ;;  %p632_p0 = scmp.ne.s32.totalorder %s768_s0, %s631_s13  ;;  %s16_s10 = int_to_ptr.vmem [resolvable:$true] %s15_s10 }
   0x4   :  { %p635_p1 = scmp.lt.u32.totalorder %s631_s13, %s768_s0 }
   0x6   :  { %p637_p2 = pnand %p635_p1, %p632_p0 }
   0x8   :  { %640 = shalt.err (!%p637_p2)
}
   0x9   :  { %s641_s18 = scalar_lea.vmem %s16_s10, 1024  ;;  %p646_p4 = scmp.lt.s32.totalorder %s16_s10, %s16_s10 }
   0xa   :  { %p642_p3 = scmp.ne.s32.totalorder %s16_s10, %s641_s18  ;;  %p647_p5 = scmp.lt.s32.totalorder %s641_s18, %s641_s18 }
   0xc   :  { %p648_p6 = por %p647_p5, %p646_p4 }
   0xe   :  { %p649_p7 = pnand %p648_p6, %p642_p3 }
  0x10   :  { %652 = shalt.err (!%p649_p7)
}
  0x11   :  { %s704_s19 = smov 64   ;;  %s705_s20 = smov 4  }
  0x12   :  { %21 = dma.hbm_to_vmem [thread:$0]  %s768_s0, 1024, %s16_s10, [#allocation4], %s704_s19, %s704_s19, %s705_s20  }
  0x13   :  { %s706_s23 = smov [#allocation6]   ;;  %s653_s27 = scalar_lea.hbm %s769_s1, 1024 }
  0x14   :  { %s27_s24 = sshll.u32 %s706_s23, 4  ;;  %p654_p8 = scmp.ne.s32.totalorder %s769_s1, %s653_s27  ;;  %s28_s24 = int_to_ptr.vmem [resolvable:$true] %s27_s24 }
  0x15   :  { %p657_p9 = scmp.lt.u32.totalorder %s653_s27, %s769_s1 }
  0x17   :  { %p659_p10 = pnand %p657_p9, %p654_p8 }
  0x19   :  { %662 = shalt.err (!%p659_p10)
}
  0x1a   :  { %s663_s4 = scalar_lea.vmem %s28_s24, 1024  ;;  %p668_p12 = scmp.lt.s32.totalorder %s28_s24, %s28_s24 }
  0x1b   :  { %p664_p11 = scmp.ne.s32.totalorder %s28_s24, %s663_s4  ;;  %p669_p13 = scmp.lt.s32.totalorder %s663_s4, %s663_s4 }
  0x1d   :  { %p670_p0 = por %p669_p13, %p668_p12 }
  0x1f   :  { %p671_p1 = pnand %p670_p0, %p664_p11 }
  0x21   :  { %674 = shalt.err (!%p671_p1)
}
  0x22   :  { %33 = dma.hbm_to_vmem [thread:$0]  %s769_s1, 1024, %s28_s24, [#allocation7], %s704_s19, %s704_s19, %s705_s20  }
  0x23   :  { %697 = dma.done.wait [#allocation4], 1024  }
  0x24   :  { %698 = vsyncadd [#allocation4], 4294966272 }
  0x25   :  { %699 = dma.done.wait [#allocation7], 1024  }
  0x26   :  { %700 = vsyncadd [#allocation7], 4294966272  ;;  %v615_v0 = vld [vmem:[#allocation6] sm:$0xff]   ;;  %v616_v1 = vld [vmem:[#allocation6 + $0x8] sm:$0xff]   ;;  %s707_s1 = smov [#allocation8]  }
  0x27   :  { %562 = vmatprep.subr.bf16.mxu0 %v615_v0  ;;  %594 = vmatprep.subr.bf16.mxu1 %v615_v0  ;;  %v617_v2 = vld [vmem:[#allocation6 + $0x10] sm:$0xff]   ;;  %v618_v3 = vld [vmem:[#allocation6 + $0x18] sm:$0xff]   ;;  %v623_v4 = vld [vmem:[#allocation3] sm:$0xff]   ;;  %s438_s6 = sshll.u32 %s707_s1, 4  ;;  %s439_s6 = int_to_ptr.vmem [resolvable:$true] %s438_s6 }
  0x28   :  { %563 = vmatpush3.bf16.msra.mxu0 %v615_v0  ;;  %602 = vmatpush3.bf16.msra.mxu1 %v615_v0  ;;  %v624_v5 = vld [vmem:[#allocation3 + $0x20] sm:$0xff]   ;;  %v620_v7 = vld [vmem:[#allocation6 + $0x28] sm:$0xff]   ;;  %v621_v8 = vld [vmem:[#allocation6 + $0x30] sm:$0xff]   ;;  %s675_s7 = scalar_lea.vmem %s439_s6, 1024  ;;  %p680_p3 = scmp.lt.s32.totalorder %s439_s6, %s439_s6 }
  0x29   :  { %564 = vmatprep.subr.bf16.mxu0 %v616_v1  ;;  %595 = vmatprep.subr.bf16.mxu1 %v616_v1  ;;  %v619_v6 = vld [vmem:[#allocation6 + $0x20] sm:$0xff]   ;;  %v622_v9 = vld [vmem:[#allocation6 + $0x38] sm:$0xff]   ;;  %v625_v10 = vld [vmem:[#allocation3 + $0x8] sm:$0xff]   ;;  %p676_p2 = scmp.ne.s32.totalorder %s439_s6, %s675_s7  ;;  %p681_p4 = scmp.lt.s32.totalorder %s675_s7, %s675_s7 }
  0x2a   :  { %578 = vmatprep.mubr.bf16.mxu0 %v623_v4  ;;  %586 = vmatprep.mubr.bf16.mxu1 %v624_v5  ;;  %v626_v11 = vld [vmem:[#allocation3 + $0x28] sm:$0xff]   ;;  %v627_v12 = vld [vmem:[#allocation3 + $0x10] sm:$0xff]   ;;  %v629_v14 = vld [vmem:[#allocation3 + $0x18] sm:$0xff]  }
  0x2b   :  { %v628_v13 = vld [vmem:[#allocation3 + $0x30] sm:$0xff]   ;;  %v630_v15 = vld [vmem:[#allocation3 + $0x38] sm:$0xff]   ;;  %p682_p5 = por %p681_p4, %p680_p3 }
  0x2c   :  { %565 = vmatpush3.bf16.msra.mxu0 %v616_v1  ;;  %603 = vmatpush3.bf16.msra.mxu1 %v616_v1 }
  0x2d   :  { %566 = vmatprep.subr.bf16.mxu0 %v617_v2  ;;  %596 = vmatprep.subr.bf16.mxu1 %v617_v2  ;;  %p683_p6 = pnand %p682_p5, %p676_p2 }
  0x30   :  { %567 = vmatpush3.bf16.msra.mxu0 %v617_v2  ;;  %604 = vmatpush3.bf16.msra.mxu1 %v617_v2 }
  0x31   :  { %568 = vmatprep.subr.bf16.mxu0 %v618_v3  ;;  %597 = vmatprep.subr.bf16.mxu1 %v618_v3 }
  0x34   :  { %569 = vmatpush3.bf16.msra.mxu0 %v618_v3  ;;  %605 = vmatpush3.bf16.msra.mxu1 %v618_v3 }
  0x35   :  { %570 = vmatprep.subr.bf16.mxu0 %v619_v6  ;;  %598 = vmatprep.subr.bf16.mxu1 %v619_v6 }
  0x38   :  { %571 = vmatpush3.bf16.msra.mxu0 %v619_v6  ;;  %606 = vmatpush3.bf16.msra.mxu1 %v619_v6 }
  0x39   :  { %572 = vmatprep.subr.bf16.mxu0 %v620_v7  ;;  %599 = vmatprep.subr.bf16.mxu1 %v620_v7 }
  0x3c   :  { %573 = vmatpush3.bf16.msra.mxu0 %v620_v7  ;;  %607 = vmatpush3.bf16.msra.mxu1 %v620_v7 }
  0x3d   :  { %574 = vmatprep.subr.bf16.mxu0 %v621_v8  ;;  %600 = vmatprep.subr.bf16.mxu1 %v621_v8 }
  0x40   :  { %575 = vmatpush3.bf16.msra.mxu0 %v621_v8  ;;  %608 = vmatpush3.bf16.msra.mxu1 %v621_v8 }
  0x41   :  { %576 = vmatprep.subr.bf16.mxu0 %v622_v9  ;;  %601 = vmatprep.subr.bf16.mxu1 %v622_v9 }
  0x44   :  { %577 = vmatpush3.bf16.msra.mxu0 %v622_v9  ;;  %609 = vmatpush3.bf16.msra.mxu1 %v622_v9 }
  0x47   :  { %579 = vmatmul.mubr.bf16.vlgmr.msra.gmra.mrb[0].mxu0 %v625_v10  ;;  %587 = vmatmul.mubr.bf16.vlgmr.msra.gmra.mrb[0].mxu1 %v626_v11 }
  0x48   :  { %582 = vmatprep.mubr.bf16.mxu0 %v627_v12  ;;  %590 = vmatprep.mubr.bf16.mxu1 %v628_v13 }
  0x4f   :  { %583 = vmatmul.mubr.bf16.gmra.mrb[4].mxu0 %v629_v14  ;;  %591 = vmatmul.mubr.bf16.gmra.mrb[4].mxu1 %v630_v15 }
 0x11a   :  { %v580_v16 = vpop.f32.mrb[0].mxu0  ;;  %v588_v17 = vpop.f32.mrb[0].mxu1 }
 0x11b   :  { %v239_v18 = vpop.f32.mrb[1].mxu0  ;;  %v271_v19 = vpop.f32.mrb[1].mxu1 }
 0x11c   :  { %v581_v20 = vpop.f32.mrb[2].mxu0  ;;  %v589_v21 = vpop.f32.mrb[2].mxu1 }
 0x11d   :  { %v507_v22 = vpack.c.bf16 %v581_v20, %v580_v16  ;;  %v527_v23 = vpack.c.bf16 %v589_v21, %v588_v17  ;;  %v242_v24 = vpop.f32.mrb[3].mxu0  ;;  %v274_v25 = vpop.f32.mrb[3].mxu1 }
 0x11e   :  { %v502_v26 = vpack.c.bf16 %v242_v24, %v239_v18  ;;  %v522_v27 = vpack.c.bf16 %v274_v25, %v271_v19 }
 0x11f   :  { %539 = vst [vmem:[#allocation8 + $0x8] sm:$0xff] %v507_v22   ;;  %543 = vst [vmem:[#allocation8 + $0x28] sm:$0xff] %v527_v23  }
 0x120   :  { %503 = vst [vmem:[#allocation8] sm:$0xff] %v502_v26   ;;  %542 = vst [vmem:[#allocation8 + $0x20] sm:$0xff] %v522_v27  }
 0x122   :  { %v584_v28 = vpop.f32.mrb[4].mxu0  ;;  %v592_v29 = vpop.f32.mrb[4].mxu1 }
 0x123   :  { %v255_v30 = vpop.f32.mrb[5].mxu0  ;;  %v287_v31 = vpop.f32.mrb[5].mxu1 }
 0x124   :  { %v585_v32 = vpop.f32.mrb[6].mxu0  ;;  %v593_v33 = vpop.f32.mrb[6].mxu1 }
 0x125   :  { %v517_v34 = vpack.c.bf16 %v585_v32, %v584_v28  ;;  %v537_v35 = vpack.c.bf16 %v593_v33, %v592_v29  ;;  %v258_v36 = vpop.f32.mrb[7].mxu0  ;;  %v290_v37 = vpop.f32.mrb[7].mxu1 }
 0x126   :  { %v512_v38 = vpack.c.bf16 %v258_v36, %v255_v30  ;;  %v532_v39 = vpack.c.bf16 %v290_v37, %v287_v31 }
 0x127   :  { %541 = vst [vmem:[#allocation8 + $0x18] sm:$0xff] %v517_v34   ;;  %545 = vst [vmem:[#allocation8 + $0x38] sm:$0xff] %v537_v35  }
 0x128   :  { %540 = vst [vmem:[#allocation8 + $0x10] sm:$0xff] %v512_v38   ;;  %544 = vst [vmem:[#allocation8 + $0x30] sm:$0xff] %v532_v39  }
 0x129   :  { %686 = shalt.err (!%p683_p6)
}
 0x12a   :  { %s687_s10 = scalar_lea.hbm %s770_s2, 1024 }
 0x12b   :  { %p688_p7 = scmp.ne.s32.totalorder %s770_s2, %s687_s10  ;;  %p691_p8 = scmp.lt.u32.totalorder %s687_s10, %s770_s2 }
 0x12d   :  { %p693_p9 = pnand %p691_p8, %p688_p7 }
 0x12f   :  { %696 = shalt.err (!%p693_p9)
}
 0x130   :  { %444 = dma.vmem_to_hbm [thread:$0]  %s439_s6, 1024, %s770_s2, [#allocation5], %s704_s19, %s704_s19, %s705_s20  }
 0x131   :  { %701 = dma.done.wait [#allocation5], 1024  }
 0x132   :  { %702 = vsyncadd [#allocation5], 4294966272 }
 0x133   :  { %448 = vsyncpa [#allocation4], 1 }
 0x134   :  { %449 = vsyncpa [#allocation7], 1 }
 0x135   :  { %450 = vsyncpa [#allocation5], 1 }

</bundles_post_ra>
